<compile_context>
chip_gen: v6e
topology: v6e:2x2x1
jax: 0.10.0
libtpu: 0.0.40
codegen_flags: <defaults>
</compile_context>

<pallas_src>
import jax
import jax.numpy as jnp
from jax.experimental import pallas as pl
from jax.experimental.pallas import tpu as pltpu

BN_EPS = 1e-5
TM_TARGET = 2048           # im2col rows per grid step (multiple of 8; ~2.3 MB/step
                           # of double-buffered VMEM -> fits v5e/v6e/v7x with headroom)
VMEM_LIMIT = 32 * 1024 * 1024


def _round_up(x, m):
    return (x + m - 1) // m * m


# --------------------------------------------------------------------------
# Kernel 1: tiled conv matmul (bf16 in, f32 acc) + BN partial sums per tile
# --------------------------------------------------------------------------
def conv_partial_kernel(p_ref, w_ref, out_ref, sum_ref, ssq_ref):
    """p: (TM, K) bf16, w: (K, Cout) bf16 -> out: (TM, Cout) f32 conv result,
    plus per-tile partial sum / sum-of-squares (replicated over 8 sublanes)."""
    acc = jnp.dot(p_ref[...], w_ref[...], preferred_element_type=jnp.float32)
    out_ref[...] = acc
    c = acc.shape[-1]
    s = jnp.sum(acc, axis=0, keepdims=True)           # (1, C)
    q = jnp.sum(acc * acc, axis=0, keepdims=True)     # (1, C)
    sum_ref[...] = jnp.broadcast_to(s[None], (1, 8, c))
    ssq_ref[...] = jnp.broadcast_to(q[None], (1, 8, c))


# --------------------------------------------------------------------------
# Kernel 2: fused BN-apply + ReLU + MaxPool 3x3 / stride 2 / pad 1 (per image)
# --------------------------------------------------------------------------
def bn_relu_pool_kernel(x_ref, scale_ref, shift_ref, out_ref, pad_ref):
    """x: (1, Ho, Wo, C) f32 conv output; scale/shift: (1, C); out: (1, Hp, Wp, C).
    pad_ref: VMEM scratch (Ho, 2*Wp+2, C) used for W-direction padding."""
    _, Ho, Wo, C = x_ref.shape
    _, Hp, Wp, _ = out_ref.shape

    # BN folded into scale/shift, then ReLU (values become >= 0, so zero padding
    # below is equivalent to PyTorch's -inf maxpool padding: every window always
    # contains its valid center tap).
    y = jnp.maximum(x_ref[0] * scale_ref[...] + shift_ref[...], 0.0)   # (Ho, Wo, C)

    # ---- W direction: 3-tap, stride 2, pad 1 via padded scratch + strided reads
    pad_ref[...] = jnp.zeros_like(pad_ref)
    pad_ref[:, 1:Wo + 1, :] = y
    yw = pad_ref[:, pl.ds(0, Wp, stride=2), :]
    yw = jnp.maximum(yw, pad_ref[:, pl.ds(1, Wp, stride=2), :])
    yw = jnp.maximum(yw, pad_ref[:, pl.ds(2, Wp, stride=2), :])        # (Ho, Wp, C)

    # ---- H direction: pad rows, even/odd pair split on the leading axis
    zhead = jnp.zeros((1, Wp, C), jnp.float32)
    ztail = jnp.zeros((2 * Hp + 1 - Ho, Wp, C), jnp.float32)
    q = jnp.concatenate([zhead, yw, ztail], axis=0)                    # (2Hp+2, Wp, C)
    q = q.reshape(Hp + 1, 2, Wp, C)                                    # leading-dim only
    e = q[:, 0]                                                        # rows 0,2,4,...
    o = q[:, 1]                                                        # rows 1,3,5,...
    out_ref[0] = jnp.maximum(jnp.maximum(e[:Hp], o[:Hp]), e[1:Hp + 1])


# --------------------------------------------------------------------------
# Host wrapper
# --------------------------------------------------------------------------
def head_layer_forward(x_nchw, conv_w, bn_gamma, bn_beta):
    """x_nchw: (N, 3, H, W) f32; conv_w: (64, 3, 7, 7); returns NCHW f32."""
    N, Cin, H, W = x_nchw.shape
    Cout, _, KH, KW = conv_w.shape
    stride, pad = 2, 3
    Ho = (H + 2 * pad - KH) // stride + 1
    Wo = (W + 2 * pad - KW) // stride + 1
    Hp = (Ho + 2 - 3) // 2 + 1
    Wp = (Wo + 2 - 3) // 2 + 1
    M = N * Ho * Wo
    K = KH * KW * Cin

    # ---- host im2col (pure indexing glue), bf16 to halve DMA bytes, no K pad ----
    x = jnp.transpose(x_nchw, (0, 2, 3, 1)).astype(jnp.bfloat16)       # NHWC
    xp = jnp.pad(x, ((0, 0), (pad, pad), (pad, pad), (0, 0)))
    taps = []
    for kh in range(KH):
        for kw in range(KW):
            taps.append(xp[:, kh:kh + stride * Ho:stride,
                           kw:kw + stride * Wo:stride, :])             # (N, Ho, Wo, Cin)
    patches = jnp.concatenate(taps, axis=-1).reshape(M, K)             # (M, 147) bf16

    # weight (Cout, Cin, KH, KW) -> (KH, KW, Cin, Cout) -> (K, Cout), tap-order match
    w_mat = jnp.transpose(conv_w, (2, 3, 1, 0)).reshape(K, Cout).astype(jnp.bfloat16)

    # ---- M-axis grid (zero row padding only if needed; zeros don't change stats) ----
    Mp = _round_up(M, 8)
    TM = min(TM_TARGET, Mp)
    G = (Mp + TM - 1) // TM
    Mp = G * TM
    if Mp > M:
        patches = jnp.pad(patches, ((0, Mp - M), (0, 0)))

    conv_out, psum, pssq = pl.pallas_call(
        conv_partial_kernel,
        grid=(G,),
        in_specs=[
            pl.BlockSpec((TM, K), lambda i: (i, 0)),        # K=147 full-extent block
            pl.BlockSpec((K, Cout), lambda i: (0, 0)),      # weights stay resident
        ],
        out_specs=[
            pl.BlockSpec((TM, Cout), lambda i: (i, 0)),
            pl.BlockSpec((1, 8, Cout), lambda i: (i, 0, 0)),
            pl.BlockSpec((1, 8, Cout), lambda i: (i, 0, 0)),
        ],
        out_shape=[
            jax.ShapeDtypeStruct((Mp, Cout), jnp.float32),
            jax.ShapeDtypeStruct((G, 8, Cout), jnp.float32),
            jax.ShapeDtypeStruct((G, 8, Cout), jnp.float32),
        ],
        compiler_params=pltpu.CompilerParams(
            dimension_semantics=("parallel",),
            vmem_limit_bytes=VMEM_LIMIT),
    )(patches, w_mat)

    # ---- global train-mode batch stats (exact, two-phase), folded to scale/shift ----
    total_sum = jnp.sum(psum[:, 0, :], axis=0)                         # (Cout,)
    total_ssq = jnp.sum(pssq[:, 0, :], axis=0)
    mean = total_sum / M
    # E[x^2]-mean^2 with clamping; zero-padded rows contribute 0 to both sums.
    var = jnp.maximum(total_ssq / M - mean * mean, 0.0)
    inv = jax.lax.rsqrt(var + BN_EPS)
    gamma = bn_gamma.astype(jnp.float32)
    beta = bn_beta.astype(jnp.float32)
    scale = (gamma * inv).reshape(1, Cout)
    shift = (beta - mean * gamma * inv).reshape(1, Cout)

    conv4 = (conv_out[:M] if Mp > M else conv_out).reshape(N, Ho, Wo, Cout)

    pooled = pl.pallas_call(
        bn_relu_pool_kernel,
        grid=(N,),
        in_specs=[
            pl.BlockSpec((1, Ho, Wo, Cout), lambda n: (n, 0, 0, 0)),
            pl.BlockSpec((1, Cout), lambda n: (0, 0)),
            pl.BlockSpec((1, Cout), lambda n: (0, 0)),
        ],
        out_specs=pl.BlockSpec((1, Hp, Wp, Cout), lambda n: (n, 0, 0, 0)),
        out_shape=jax.ShapeDtypeStruct((N, Hp, Wp, Cout), jnp.float32),
        scratch_shapes=[pltpu.VMEM((Ho, 2 * Wp + 2, Cout), jnp.float32)],
        compiler_params=pltpu.CompilerParams(
            dimension_semantics=("parallel",),
            vmem_limit_bytes=VMEM_LIMIT),
    )(conv4, scale, shift)

    return jnp.transpose(pooled, (0, 3, 1, 2))                         # back to NCHW


# --------------------------------------------------------------------------
# main
# --------------------------------------------------------------------------
if __name__ == "__main__":
    key = jax.random.PRNGKey(0)
    kx, kw = jax.random.split(key)

    # small NCHW input consistent with conv1 (3 -> 64)
    x = jax.random.normal(kx, (2, 3, 16, 16), dtype=jnp.float32)

    # deterministic synthetic parameters (shapes from HeadLayer.__init__)
    conv_w = jax.random.normal(kw, (64, 3, 7, 7), dtype=jnp.float32) * 0.05
    bn_gamma = jnp.ones((64,), dtype=jnp.float32)
    bn_beta = jnp.zeros((64,), dtype=jnp.float32)

    fwd = jax.jit(head_layer_forward)
    out = fwd(x, conv_w, bn_gamma, bn_beta)
    jax.block_until_ready(out)

    assert out.shape == (2, 64, 4, 4), out.shape
    assert out.dtype == jnp.float32
    print("KERNEL_OK")
</pallas_src>

<mosaic_0001>
module attributes {stable_mosaic.version = 11 : i64} {
  func.func @conv_partial_kernel(%arg0: i32, %arg1: memref<128x147xbf16, #tpu.memory_space<vmem>>, %arg2: memref<147x64xbf16, #tpu.memory_space<vmem>>, %arg3: memref<128x64xf32, #tpu.memory_space<vmem>>, %arg4: memref<1x8x64xf32, #tpu.memory_space<vmem>>, %arg5: memref<1x8x64xf32, #tpu.memory_space<vmem>>) attributes {dimension_semantics = [#tpu.dimension_semantics<parallel>], iteration_bounds = array<i64: 1>, scalar_prefetch = 0 : i64, scratch_operands = 0 : i64, tpu.core_type = #tpu.core_type<tc>, window_params = [{transform_indices = @transform_0, window_bounds = array<i64: 128, 147>}, {pipeline_mode = #tpu.pipeline_mode<synchronous>, transform_indices = @transform_1, window_bounds = array<i64: 147, 64>}, {transform_indices = @transform_2, window_bounds = array<i64: 128, 64>}, {transform_indices = @transform_3, window_bounds = array<i64: 1, 8, 64>}, {transform_indices = @transform_4, window_bounds = array<i64: 1, 8, 64>}]} {
    %c0 = arith.constant 0 : index
    %c0_0 = arith.constant 0 : index
    %0 = vector.load %arg1[%c0, %c0_0] : memref<128x147xbf16, #tpu.memory_space<vmem>>, vector<128x147xbf16>
    %c0_1 = arith.constant 0 : index
    %c0_2 = arith.constant 0 : index
    %1 = vector.load %arg2[%c0_1, %c0_2] : memref<147x64xbf16, #tpu.memory_space<vmem>>, vector<147x64xbf16>
    %cst = arith.constant dense<0.000000e+00> : vector<128x64xf32>
    %2 = tpu.matmul %0, %1, %cst {dimension_numbers = #tpu.dot_dimension_numbers<[1], [0], [0], [1], [0, 0, 1, 1], [], []>} : vector<128x147xbf16>, vector<147x64xbf16>, vector<128x64xf32> -> vector<128x64xf32>
    %c0_3 = arith.constant 0 : index
    %c0_4 = arith.constant 0 : index
    %3 = vector.load %arg3[%c0_3, %c0_4] : memref<128x64xf32, #tpu.memory_space<vmem>>, vector<128x64xf32>
    tpu.vector_store %arg3[%c0_3, %c0_4], %2 {strides = array<i32>} : memref<128x64xf32, #tpu.memory_space<vmem>>, vector<128x64xf32>,
    %cst_5 = arith.constant dense<0.000000e+00> : vector<64xf32>
    %4 = vector.multi_reduction <add>, %2, %cst_5 [0] : vector<128x64xf32> to vector<64xf32>
    %5 = vector.shape_cast %4 : vector<64xf32> to vector<1x64xf32>
    %6 = arith.mulf %2, %2 : vector<128x64xf32>
    %cst_6 = arith.constant dense<0.000000e+00> : vector<64xf32>
    %7 = vector.multi_reduction <add>, %6, %cst_6 [0] : vector<128x64xf32> to vector<64xf32>
    %8 = vector.shape_cast %7 : vector<64xf32> to vector<1x64xf32>
    %9 = vector.shape_cast %5 : vector<1x64xf32> to vector<1x1x64xf32>
    %10 = vector.shape_cast %9 : vector<1x1x64xf32> to vector<1x1x64xf32>
    %11 = vector.broadcast %10 : vector<1x1x64xf32> to vector<1x8x64xf32>
    %c0_7 = arith.constant 0 : index
    %c0_8 = arith.constant 0 : index
    %c0_9 = arith.constant 0 : index
    %12 = vector.load %arg4[%c0_7, %c0_8, %c0_9] : memref<1x8x64xf32, #tpu.memory_space<vmem>>, vector<1x8x64xf32>
    tpu.vector_store %arg4[%c0_7, %c0_8, %c0_9], %11 {strides = array<i32>} : memref<1x8x64xf32, #tpu.memory_space<vmem>>, vector<1x8x64xf32>,
    %13 = vector.shape_cast %8 : vector<1x64xf32> to vector<1x1x64xf32>
    %14 = vector.shape_cast %13 : vector<1x1x64xf32> to vector<1x1x64xf32>
    %15 = vector.broadcast %14 : vector<1x1x64xf32> to vector<1x8x64xf32>
    %c0_10 = arith.constant 0 : index
    %c0_11 = arith.constant 0 : index
    %c0_12 = arith.constant 0 : index
    %16 = vector.load %arg5[%c0_10, %c0_11, %c0_12] : memref<1x8x64xf32, #tpu.memory_space<vmem>>, vector<1x8x64xf32>
    tpu.vector_store %arg5[%c0_10, %c0_11, %c0_12], %15 {strides = array<i32>} : memref<1x8x64xf32, #tpu.memory_space<vmem>>, vector<1x8x64xf32>,
    return
  }
  func.func @transform_0(%arg0: i32) -> (i32, i32) {
    %c0_i32 = arith.constant 0 : i32
    %c0_i32_0 = arith.constant 0 : i32
    return %arg0, %c0_i32 : i32, i32
  }
  func.func @transform_1(%arg0: i32) -> (i32, i32) {
    %c0_i32 = arith.constant 0 : i32
    %c0_i32_0 = arith.constant 0 : i32
    %c0_i32_1 = arith.constant 0 : i32
    return %c0_i32, %c0_i32_0 : i32, i32
  }
  func.func @transform_2(%arg0: i32) -> (i32, i32) {
    %c0_i32 = arith.constant 0 : i32
    %c0_i32_0 = arith.constant 0 : i32
    return %arg0, %c0_i32 : i32, i32
  }
  func.func @transform_3(%arg0: i32) -> (i32, i32, i32) {
    %c0_i32 = arith.constant 0 : i32
    %c0_i32_0 = arith.constant 0 : i32
    %c0_i32_1 = arith.constant 0 : i32
    return %arg0, %c0_i32, %c0_i32_0 : i32, i32, i32
  }
  func.func @transform_4(%arg0: i32) -> (i32, i32, i32) {
    %c0_i32 = arith.constant 0 : i32
    %c0_i32_0 = arith.constant 0 : i32
    %c0_i32_1 = arith.constant 0 : i32
    return %arg0, %c0_i32, %c0_i32_0 : i32, i32, i32
  }
}

module attributes {stable_mosaic.version = 11 : i64} {
  func.func @bn_relu_pool_kernel(%arg0: i32, %arg1: memref<1x8x8x64xf32, #tpu.memory_space<vmem>>, %arg2: memref<1x64xf32, #tpu.memory_space<vmem>>, %arg3: memref<1x64xf32, #tpu.memory_space<vmem>>, %arg4: memref<1x4x4x64xf32, #tpu.memory_space<vmem>>, %arg5: memref<8x10x64xf32, #tpu.memory_space<vmem>>) attributes {dimension_semantics = [#tpu.dimension_semantics<parallel>], iteration_bounds = array<i64: 2>, scalar_prefetch = 0 : i64, scratch_operands = 1 : i64, tpu.core_type = #tpu.core_type<tc>, window_params = [{transform_indices = @transform_0, window_bounds = array<i64: 1, 8, 8, 64>}, {pipeline_mode = #tpu.pipeline_mode<synchronous>, transform_indices = @transform_1, window_bounds = array<i64: 1, 64>}, {pipeline_mode = #tpu.pipeline_mode<synchronous>, transform_indices = @transform_2, window_bounds = array<i64: 1, 64>}, {transform_indices = @transform_3, window_bounds = array<i64: 1, 4, 4, 64>}]} {
    %c0 = arith.constant 0 : index
    %c0_0 = arith.constant 0 : index
    %c0_1 = arith.constant 0 : index
    %c0_2 = arith.constant 0 : index
    %0 = vector.load %arg1[%c0, %c0_0, %c0_1, %c0_2] : memref<1x8x8x64xf32, #tpu.memory_space<vmem>>, vector<1x8x8x64xf32>
    %1 = vector.shape_cast %0 : vector<1x8x8x64xf32> to vector<8x8x64xf32>
    %c0_3 = arith.constant 0 : index
    %c0_4 = arith.constant 0 : index
    %2 = vector.load %arg2[%c0_3, %c0_4] : memref<1x64xf32, #tpu.memory_space<vmem>>, vector<1x64xf32>
    %3 = vector.shape_cast %2 : vector<1x64xf32> to vector<1x1x64xf32>
    %4 = vector.broadcast %3 : vector<1x1x64xf32> to vector<8x8x64xf32>
    %5 = arith.mulf %1, %4 : vector<8x8x64xf32>
    %c0_5 = arith.constant 0 : index
    %c0_6 = arith.constant 0 : index
    %6 = vector.load %arg3[%c0_5, %c0_6] : memref<1x64xf32, #tpu.memory_space<vmem>>, vector<1x64xf32>
    %7 = vector.shape_cast %6 : vector<1x64xf32> to vector<1x1x64xf32>
    %8 = vector.broadcast %7 : vector<1x1x64xf32> to vector<8x8x64xf32>
    %9 = arith.addf %5, %8 : vector<8x8x64xf32>
    %cst = arith.constant 0.000000e+00 : f32
    %10 = vector.broadcast %cst : f32 to vector<8x8x64xf32>
    %11 = arith.maximumf %9, %10 : vector<8x8x64xf32>
    %cst_7 = arith.constant 0.000000e+00 : f32
    %12 = vector.broadcast %cst_7 : f32 to vector<8x10x64xf32>
    %c0_8 = arith.constant 0 : index
    %c0_9 = arith.constant 0 : index
    %c0_10 = arith.constant 0 : index
    %13 = vector.load %arg5[%c0_8, %c0_9, %c0_10] : memref<8x10x64xf32, #tpu.memory_space<vmem>>, vector<8x10x64xf32>
    tpu.vector_store %arg5[%c0_8, %c0_9, %c0_10], %12 {strides = array<i32>} : memref<8x10x64xf32, #tpu.memory_space<vmem>>, vector<8x10x64xf32>,
    %c0_11 = arith.constant 0 : index
    %c1 = arith.constant 1 : index
    %c0_12 = arith.constant 0 : index
    %14 = vector.load %arg5[%c0_11, %c1, %c0_12] : memref<8x10x64xf32, #tpu.memory_space<vmem>>, vector<8x8x64xf32>
    tpu.vector_store %arg5[%c0_11, %c1, %c0_12], %11 {strides = array<i32>} : memref<8x10x64xf32, #tpu.memory_space<vmem>>, vector<8x8x64xf32>,
    %c0_13 = arith.constant 0 : index
    %c0_14 = arith.constant 0 : index
    %c0_15 = arith.constant 0 : index
    %15 = tpu.strided_load %arg5[%c0_13, %c0_14, %c0_15] {strides = array<i32: 1, 2, 1>} : memref<8x10x64xf32, #tpu.memory_space<vmem>>, vector<8x4x64xf32>
    %c0_16 = arith.constant 0 : index
    %c1_17 = arith.constant 1 : index
    %c0_18 = arith.constant 0 : index
    %16 = tpu.strided_load %arg5[%c0_16, %c1_17, %c0_18] {strides = array<i32: 1, 2, 1>} : memref<8x10x64xf32, #tpu.memory_space<vmem>>, vector<8x4x64xf32>
    %17 = arith.maximumf %15, %16 : vector<8x4x64xf32>
    %c0_19 = arith.constant 0 : index
    %c2 = arith.constant 2 : index
    %c0_20 = arith.constant 0 : index
    %18 = tpu.strided_load %arg5[%c0_19, %c2, %c0_20] {strides = array<i32: 1, 2, 1>} : memref<8x10x64xf32, #tpu.memory_space<vmem>>, vector<8x4x64xf32>
    %19 = arith.maximumf %17, %18 : vector<8x4x64xf32>
    %cst_21 = arith.constant 0.000000e+00 : f32
    %20 = vector.broadcast %cst_21 : f32 to vector<1x4x64xf32>
    %cst_22 = arith.constant 0.000000e+00 : f32
    %21 = vector.broadcast %cst_22 : f32 to vector<1x4x64xf32>
    %22 = tpu.concatenate %20, %19, %21 in 0 : vector<1x4x64xf32>, vector<8x4x64xf32>, vector<1x4x64xf32> -> vector<10x4x64xf32>
    %23 = vector.shape_cast %22 : vector<10x4x64xf32> to vector<5x2x4x64xf32>
    %24 = vector.extract_strided_slice %23 {offsets = [0, 0, 0, 0], sizes = [5, 1, 4, 64], strides = [1, 1, 1, 1]} : vector<5x2x4x64xf32> to vector<5x1x4x64xf32>
    %25 = vector.shape_cast %24 : vector<5x1x4x64xf32> to vector<5x4x64xf32>
    %26 = vector.extract_strided_slice %23 {offsets = [0, 1, 0, 0], sizes = [5, 1, 4, 64], strides = [1, 1, 1, 1]} : vector<5x2x4x64xf32> to vector<5x1x4x64xf32>
    %27 = vector.shape_cast %26 : vector<5x1x4x64xf32> to vector<5x4x64xf32>
    %28 = vector.extract_strided_slice %25 {offsets = [0, 0, 0], sizes = [4, 4, 64], strides = [1, 1, 1]} : vector<5x4x64xf32> to vector<4x4x64xf32>
    %29 = vector.extract_strided_slice %27 {offsets = [0, 0, 0], sizes = [4, 4, 64], strides = [1, 1, 1]} : vector<5x4x64xf32> to vector<4x4x64xf32>
    %30 = arith.maximumf %28, %29 : vector<4x4x64xf32>
    %31 = vector.extract_strided_slice %25 {offsets = [1, 0, 0], sizes = [4, 4, 64], strides = [1, 1, 1]} : vector<5x4x64xf32> to vector<4x4x64xf32>
    %32 = arith.maximumf %30, %31 : vector<4x4x64xf32>
    %c0_23 = arith.constant 0 : index
    %c0_24 = arith.constant 0 : index
    %c0_25 = arith.constant 0 : index
    %c0_26 = arith.constant 0 : index
    %33 = vector.load %arg4[%c0_23, %c0_24, %c0_25, %c0_26] : memref<1x4x4x64xf32, #tpu.memory_space<vmem>>, vector<1x4x4x64xf32>
    %34 = vector.shape_cast %33 : vector<1x4x4x64xf32> to vector<4x4x64xf32>
    %35 = vector.shape_cast %32 : vector<4x4x64xf32> to vector<1x4x4x64xf32>
    tpu.vector_store %arg4[%c0_23, %c0_24, %c0_25, %c0_26], %35 {strides = array<i32>} : memref<1x4x4x64xf32, #tpu.memory_space<vmem>>, vector<1x4x4x64xf32>,
    return
  }
  func.func @transform_0(%arg0: i32) -> (i32, i32, i32, i32) {
    %c0_i32 = arith.constant 0 : i32
    %c0_i32_0 = arith.constant 0 : i32
    %c0_i32_1 = arith.constant 0 : i32
    %c0_i32_2 = arith.constant 0 : i32
    return %arg0, %c0_i32, %c0_i32_0, %c0_i32_1 : i32, i32, i32, i32
  }
  func.func @transform_1(%arg0: i32) -> (i32, i32) {
    %c0_i32 = arith.constant 0 : i32
    %c0_i32_0 = arith.constant 0 : i32
    %c0_i32_1 = arith.constant 0 : i32
    return %c0_i32, %c0_i32_0 : i32, i32
  }
  func.func @transform_2(%arg0: i32) -> (i32, i32) {
    %c0_i32 = arith.constant 0 : i32
    %c0_i32_0 = arith.constant 0 : i32
    %c0_i32_1 = arith.constant 0 : i32
    return %c0_i32, %c0_i32_0 : i32, i32
  }
  func.func @transform_3(%arg0: i32) -> (i32, i32, i32, i32) {
    %c0_i32 = arith.constant 0 : i32
    %c0_i32_0 = arith.constant 0 : i32
    %c0_i32_1 = arith.constant 0 : i32
    %c0_i32_2 = arith.constant 0 : i32
    return %arg0, %c0_i32, %c0_i32_0, %c0_i32_1 : i32, i32, i32, i32
  }
}

</mosaic_0001>

<bundles_post_ra>
// kernel: head_layer_forward.3
= control target key start
LH: loop header
LB: loop body
LE: loop exit
PB: predicated region body
PF: predicated region fallthrough
CT: control target
= control target key end

     0   :  { %8 = vsyncpa [#allocation4], 0  ;;  %s682_s0 = inlined_call_operand.vmem [shape: f32[2,8,8,64], index: 0, kind: input, shape index: {}]   ;;  %s683_s1 = inlined_call_operand.vmem [shape: f32[1,64], index: 1, kind: input, shape index: {}]   ;;  %s684_s2 = inlined_call_operand.vmem [shape: f32[1,64], index: 2, kind: input, shape index: {}]   ;;  %s685_s3 = inlined_call_operand.hbm [shape: f32[2,4,4,64], index: 3, kind: output, shape index: {}]  }
   0x1   :  { %10 = vsyncpa [#allocation4 + $0x1], 0  ;;  %s537_s12 = smov 0   ;;  %s539_s13 = smov 0  }
   0x2   :  { %s541_s14 = smov 0   ;;  %s543_s15 = smov 0  }
   0x3 LB: > { %s558_s16 = sadd.s32 4294967295, %s511_s15   ;;  %s393_s17 = sadd.s32 4294967294, %s511_s15   ;;  %s511_s15 = sphi %s543_s15, %s691_s15   ;;  %s507_s14 = sphi %s541_s14, %s690_s14   ;;  %s503_s13 = sphi %s539_s13, %s689_s13   ;;  %s499_s12 = sphi %s537_s12, %s688_s12  }
   0x4   : > { %s562_s18 = sadd.s32 1, %s511_s15   ;;  %s91_s19 = sadd.s32 1, %s507_s14 }
   0x5   : > { %s88_s20 = ssub.s32 %s511_s15, %s562_s18  ;;  %p101_p0 = scmp.ne.s32.totalorder %s507_s14, %s503_s13 }
   0x6   : > { %p89_p1 = scmp.eq.s32.totalorder %s88_s20, 0  ;;  %p102_p2 = scmp.eq.s32.totalorder %s558_s16, 1 }
   0x7   : > { %p107_p3 = scmp.ne.s32.totalorder %s503_s13, %s499_s12  ;;  %p108_p4 = scmp.eq.s32.totalorder %s393_s17, 1 }
   0x8   : > { %s573_s21 = scalar_select %p89_p1, %s507_s14, %s91_s19  }
   0x9   : > { %p575_p5 = por %p102_p2, %p101_p0  ;;  %p579_p6 = por %p108_p4, %p107_p3 }
   0xa   : > { %p396_p7 = scmp.ge.s32.totalorder %s511_s15, 1  ;;  %p140_p8 = scmp.lt.s32.totalorder %s511_s15, 3 }
   0xc   : > { %p141_p9 = pnand %p396_p7, %p140_p8 }
   0xd   : > { %p164_p10 = scmp.lt.s32.totalorder (!%p141_p9), %s558_s16, 1  ;;  %s161_s6 = sand.u32 (!%p141_p9), 1, %s503_s13  }
   0xe   : > { %144 = sbr.rel (%p141_p9) target bundleno = 72 (0x48), region = 32  ;;  %s625_s7 = sshll.u32 (!%p141_p9), %s161_s6, 4 }
   0xf   : > { %s163_s8 = scalar_lea.vmem (!%p141_p9), [#allocation3], %s625_s7  ;;  %s408_s10 = sshll.u32 (!%p141_p9), %s558_s16, 8 }
  0x10   : > { %s331_s9 = sshll.u32 (!%p141_p9), %s163_s8, 4  ;;  %s637_s19 = scalar_lea.hbm (!%p141_p9), %s685_s3, %s408_s10  ;;  %s631_s9 = int_to_ptr.vmem [resolvable:$true] %s331_s9 }
  0x11   : > { %s451_s20 = scalar_lea.vmem (!%p141_p9), %s631_s9, 256 }
  0x12   : > { %p452_p11 = scmp.ne.s32.totalorder (!%p141_p9), %s631_s9, %s451_s20 }
  0x13   : > { %vm215_vm0 = vcmask 523264   ;;  %vm217_vm1 = vcmask 517120   ;;  %v513_v0 = vmov 0.0   ;;  %s165_s24 = scalar_select %p164_p10, %s558_s16, 1  ;;  %v400_v1 = vld [vmem:[%s683_s1] ss:$0 sm:$0xff] }
  0x14   : > { %216 = vst.msk [vmem:[#allocation2] sm:$0xff] %vm215_vm0, %v513_v0  ;;  %219 = vst.msk [vmem:[#allocation2 + $0x10] sm:$0xff] %vm215_vm0, %v513_v0  ;;  %v401_v2 = vld [vmem:[%s684_s2] ss:$0 sm:$0xff]  ;;  %vm312_vm2 = vcmask 519168   ;;  %s642_s16 = scalar_lea.sflag [#allocation4], %s161_s6  ;;  %p453_p12 = pnand %p452_p11, %p575_p5 }
  0x15   : > { %221 = vst.msk [vmem:[#allocation2 + $0x20] sm:$0xff] %vm215_vm0, %v513_v0  ;;  %223 = vst.msk [vmem:[#allocation2 + $0x30] sm:$0xff] %vm215_vm0, %v513_v0  ;;  %s407_s25 = sshll.u32 %s165_s24, 6  ;;  %s514_s24 = smov [#allocation3]  }
  0x16   : > { %225 = vst.msk [vmem:[#allocation2 + $0x40] sm:$0xff] %vm215_vm0, %v513_v0  ;;  %227 = vst.msk [vmem:[#allocation2 + $0x50] sm:$0xff] %vm215_vm0, %v513_v0  ;;  %s168_s30 = scalar_lea.vmem %s682_s0, %s407_s25  ;;  %p454_p13 = pneg %p453_p12 }
  0x17   : > { %229 = vst.msk [vmem:[#allocation2 + $0x60] sm:$0xff] %vm215_vm0, %v513_v0  ;;  %231 = vst.msk [vmem:[#allocation2 + $0x70] sm:$0xff] %vm215_vm0, %v513_v0  ;;  %v169_v3 = vld [vmem:[%s168_s30] sm:$0xff]  ;;  %v170_v4 = vld [vmem:[%s168_s30 + $0x8] sm:$0xff]  ;;  %s455_s25 = sshll.u32 %s514_s24, 4  ;;  %s456_s25 = int_to_ptr.vmem [resolvable:$false] %s455_s25 }
  0x18   : > { %218 = vst.msk [vmem:[#allocation2 + $0x8] sm:$0x3] %vm217_vm1, %v513_v0  ;;  %220 = vst.msk [vmem:[#allocation2 + $0x18] sm:$0x3] %vm217_vm1, %v513_v0  ;;  %v171_v5 = vld [vmem:[%s168_s30 + $0x10] sm:$0xff]  ;;  %v184_v6 = vmul.f32 %v400_v1, %v169_v3  ;;  %v185_v7 = vmul.f32 %v400_v1, %v170_v4  ;;  %v172_v9 = vld [vmem:[%s168_s30 + $0x18] sm:$0xff]  ;;  %p458_p0 = scmp.lt.s32.totalorder %s631_s9, %s456_s25 }
  0x19   : > { %222 = vst.msk [vmem:[#allocation2 + $0x28] sm:$0x3] %vm217_vm1, %v513_v0  ;;  %224 = vst.msk [vmem:[#allocation2 + $0x38] sm:$0x3] %vm217_vm1, %v513_v0  ;;  %v186_v8 = vmul.f32 %v400_v1, %v171_v5  ;;  %v173_v10 = vld [vmem:[%s168_s30 + $0x20] sm:$0xff]  ;;  %v174_v11 = vld [vmem:[%s168_s30 + $0x28] sm:$0xff]  ;;  %v187_v12 = vmul.f32 %v400_v1, %v172_v9 }
  0x1a   : > { %226 = vst.msk [vmem:[#allocation2 + $0x48] sm:$0x3] %vm217_vm1, %v513_v0  ;;  %228 = vst.msk [vmem:[#allocation2 + $0x58] sm:$0x3] %vm217_vm1, %v513_v0  ;;  %v188_v13 = vmul.f32 %v400_v1, %v173_v10  ;;  %v189_v14 = vmul.f32 %v400_v1, %v174_v11  ;;  %v175_v15 = vld [vmem:[%s168_s30 + $0x30] sm:$0xff]  ;;  %v176_v16 = vld [vmem:[%s168_s30 + $0x38] sm:$0xff]  ;;  %v199_v17 = vadd.f32 %v401_v2, %v184_v6 }
  0x1b   : > { %230 = vst.msk [vmem:[#allocation2 + $0x68] sm:$0x3] %vm217_vm1, %v513_v0  ;;  %232 = vst.msk [vmem:[#allocation2 + $0x78] sm:$0x3] %vm217_vm1, %v513_v0  ;;  %v200_v18 = vadd.f32 %v401_v2, %v185_v7  ;;  %v201_v19 = vadd.f32 %v401_v2, %v186_v8  ;;  %v190_v20 = vmul.f32 %v400_v1, %v175_v15  ;;  %s457_s26 = scalar_lea.vmem %s456_s25, 512 }
  0x1c   : > { %v202_v21 = vadd.f32 %v401_v2, %v187_v12  ;;  %v203_v22 = vadd.f32 %v401_v2, %v188_v13  ;;  %v204_v23 = vadd.f32 %v401_v2, %v189_v14  ;;  %v191_v24 = vmul.f32 %v400_v1, %v176_v16  ;;  %p459_p1 = scmp.lt.s32.totalorder %s457_s26, %s451_s20 }
  0x1d   : > { %v207_v25 = vmax.f32 %v199_v17, 0.0  ;;  %v208_v26 = vmax.f32 %v200_v18, 0.0  ;;  %v209_v27 = vmax.f32 %v201_v19, 0.0  ;;  %v205_v28 = vadd.f32 %v401_v2, %v190_v20 }
  0x1e   : > { %v210_v29 = vmax.f32 %v202_v21, 0.0  ;;  %v211_v30 = vmax.f32 %v203_v22, 0.0  ;;  %v212_v31 = vmax.f32 %v204_v23, 0.0  ;;  %v206_v32 = vadd.f32 %v401_v2, %v191_v24  ;;  %p460_p2 = por %p459_p1, %p458_p0 }
  0x1f   : > { %233 = vst.msk [vmem:[#allocation2 + $0x1] sm:$0xff] %vm215_vm0, %v207_v25  ;;  %234 = vst.msk [vmem:[#allocation2 + $0x11] sm:$0xff] %vm215_vm0, %v208_v26  ;;  %v213_v33 = vmax.f32 %v205_v28, 0.0 }
  0x20   : > { %235 = vst.msk [vmem:[#allocation2 + $0x21] sm:$0xff] %vm215_vm0, %v209_v27  ;;  %236 = vst.msk [vmem:[#allocation2 + $0x31] sm:$0xff] %vm215_vm0, %v210_v29  ;;  %v214_v34 = vmax.f32 %v206_v32, 0.0  ;;  %p461_p3 = pnand %p460_p2, %p454_p13 }
  0x21   : > { %237 = vst.msk [vmem:[#allocation2 + $0x41] sm:$0xff] %vm215_vm0, %v211_v30  ;;  %238 = vst.msk [vmem:[#allocation2 + $0x51] sm:$0xff] %vm215_vm0, %v212_v31 }
  0x22   : > { %239 = vst.msk [vmem:[#allocation2 + $0x61] sm:$0xff] %vm215_vm0, %v213_v33  ;;  %240 = vst.msk [vmem:[#allocation2 + $0x71] sm:$0xff] %vm215_vm0, %v214_v34 }
  0x26   : > { %v241_v35 = vld [vmem:[#allocation2] ss:$2 sm:$0xf]  ;;  %v243_v36 = vld [vmem:[#allocation2 + $0x10] ss:$2 sm:$0xf] }
  0x27   : > { %v257_v37 = vld [vmem:[#allocation2 + $0x1] ss:$2 sm:$0xf]  ;;  %v259_v38 = vld [vmem:[#allocation2 + $0x11] ss:$2 sm:$0xf] }
  0x28   : > { %v272_v39 = vmax.f32 %v241_v35, %v257_v37  ;;  %v273_v40 = vmax.f32 %v243_v36, %v259_v38  ;;  %v281_v41 = vld [vmem:[#allocation2 + $0x2] ss:$2 sm:$0xf]  ;;  %v283_v42 = vld [vmem:[#allocation2 + $0x12] ss:$2 sm:$0xf] }
  0x29   : > { %v245_v43 = vld [vmem:[#allocation2 + $0x20] ss:$2 sm:$0xf]  ;;  %v247_v44 = vld [vmem:[#allocation2 + $0x30] ss:$2 sm:$0xf] }
  0x2a   : > { %v296_v45 = vmax.f32 %v272_v39, %v281_v41  ;;  %v261_v46 = vld [vmem:[#allocation2 + $0x21] ss:$2 sm:$0xf]  ;;  %v263_v47 = vld [vmem:[#allocation2 + $0x31] ss:$2 sm:$0xf]  ;;  %v297_v48 = vmax.f32 %v273_v40, %v283_v42 }
  0x2b   : > { %v274_v49 = vmax.f32 %v245_v43, %v261_v46  ;;  %v275_v50 = vmax.f32 %v247_v44, %v263_v47  ;;  %v285_v51 = vld [vmem:[#allocation2 + $0x22] ss:$2 sm:$0xf]  ;;  %v287_v52 = vld [vmem:[#allocation2 + $0x32] ss:$2 sm:$0xf] }
  0x2c   : > { %v304_v53 = vmax.f32 %v296_v45, 0.0  ;;  %v249_v54 = vld [vmem:[#allocation2 + $0x40] ss:$2 sm:$0xf] }
  0x2d   : > { %v298_v55 = vmax.f32 %v274_v49, %v285_v51  ;;  %v251_v56 = vld [vmem:[#allocation2 + $0x50] ss:$2 sm:$0xf]  ;;  %v265_v57 = vld [vmem:[#allocation2 + $0x41] ss:$2 sm:$0xf]  ;;  %v299_v59 = vmax.f32 %v275_v50, %v287_v52 }
  0x2e   : > { %v308_v58 = vmax.f32 %v304_v53, %v297_v48  ;;  %v267_v60 = vld [vmem:[#allocation2 + $0x51] ss:$2 sm:$0xf]  ;;  %v276_v61 = vmax.f32 %v249_v54, %v265_v57  ;;  %v289_v62 = vld [vmem:[#allocation2 + $0x42] ss:$2 sm:$0xf] }
  0x2f   : > { %v305_v63 = vmax.f32 %v297_v48, %v298_v55  ;;  %v277_v0 = vmax.f32 %v251_v56, %v267_v60  ;;  %v291_v1 = vld [vmem:[#allocation2 + $0x52] ss:$2 sm:$0xf]  ;;  %v253_v2 = vld [vmem:[#allocation2 + $0x60] ss:$2 sm:$0xf] }
  0x30   : > { %313 = vst.msk [vmem:[%s163_s8] sm:$0xf] %vm312_vm2, %v308_v58  ;;  %v300_v3 = vmax.f32 %v276_v61, %v289_v62  ;;  %v255_v4 = vld [vmem:[#allocation2 + $0x70] ss:$2 sm:$0xf] }
  0x31   : > { %v269_v5 = vld [vmem:[#allocation2 + $0x61] ss:$2 sm:$0xf]  ;;  %v309_v6 = vmax.f32 %v305_v63, %v299_v59  ;;  %v301_v7 = vmax.f32 %v277_v0, %v291_v1  ;;  %v271_v8 = vld [vmem:[#allocation2 + $0x71] ss:$2 sm:$0xf] }
  0x32   : > { %v278_v9 = vmax.f32 %v253_v2, %v269_v5  ;;  %v306_v10 = vmax.f32 %v299_v59, %v300_v3  ;;  %v279_v11 = vmax.f32 %v255_v4, %v271_v8  ;;  %v293_v12 = vld [vmem:[#allocation2 + $0x62] ss:$2 sm:$0xf]  ;;  %v295_v13 = vld [vmem:[#allocation2 + $0x72] ss:$2 sm:$0xf] }
  0x33   : > { %314 = vst.msk [vmem:[%s163_s8 + $0x4] sm:$0xf] %vm312_vm2, %v309_v6 }
  0x34   : > { %v302_v14 = vmax.f32 %v278_v9, %v293_v12  ;;  %v310_v15 = vmax.f32 %v306_v10, %v301_v7  ;;  %v303_v16 = vmax.f32 %v279_v11, %v295_v13 }
  0x36   : > { %v307_v17 = vmax.f32 %v301_v7, %v302_v14  ;;  %315 = vst.msk [vmem:[%s163_s8 + $0x8] sm:$0xf] %vm312_vm2, %v310_v15 }
  0x38   : > { %v311_v18 = vmax.f32 %v307_v17, %v303_v16 }
  0x3a   : > { %316 = vst.msk [vmem:[%s163_s8 + $0xc] sm:$0xf] %vm312_vm2, %v311_v18 }
  0x3b   : > { %464 = shalt.err (!%p461_p3)
}
  0x3c   : > { %s465_s27 = scalar_lea.hbm %s637_s19, 256  ;;  %s469_s30 = scalar_lea.hbm %s685_s3, 512 }
  0x3d   : > { %p466_p4 = scmp.ne.s32.totalorder %s637_s19, %s465_s27  ;;  %p470_p9 = scmp.lt.s32.totalorder %s637_s19, %s685_s3 }
  0x3e   : > { %p471_p10 = scmp.lt.s32.totalorder %s469_s30, %s465_s27 }
  0x3f   : > { %p467_p7 = pnand %p466_p4, %p575_p5 }
  0x40   : > { %p472_p11 = por %p471_p10, %p470_p9 }
  0x41   : > { %p468_p8 = pneg %p467_p7 }
  0x43   : > { %p473_p12 = pnand %p472_p11, %p468_p8 }
  0x45   : > { %476 = shalt.err (!%p473_p12)
}
  0x46   : > { %s515_s6 = smov 64   ;;  %s516_s7 = smov 4  }
  0x47   : > { %409 = dma.vmem_to_hbm [thread:$0]  (%p575_p5), %s631_s9, 256, %s637_s19, %s642_s16, %s515_s6, %s515_s6, %s516_s7  }
  0x48 PF: > { %p415_p13 = scmp.ge.s32.totalorder %s511_s15, 2  ;;  %s346_s8 = sand.u32 1, %s499_s12  }
  0x49   : > { %s347_s10 = scalar_lea.sflag [#allocation4], %s346_s8 }
  0x4a   : > { %p412_p0 = pnand %p415_p13, %p579_p6 }
  0x4c   : > { %p413_p1 = pneg %p412_p0 }
  0x4e   : > { %494 = dma.done.wait (%p413_p1), %s347_s10, 256  }
  0x4f   : > { %496 = vsyncadd (%p413_p1), %s347_s10, 4294967040  ;;  %p13_p2 = scmp.ge.s32.totalorder %s562_s18, 4   ;;  %s688_s12 = smov %s503_s13 }
  0x50   : > { %s689_s13 = smov %s507_s14  ;;  %s690_s14 = smov %s573_s21 }
  0x51   : > { %s691_s15 = smov %s562_s18  ;;  %15 = sbr.rel (!%p13_p2) target bundleno = 3 (0x3), region = 90 }
  0x56   :  { %352 = vsyncpa [#allocation4], 1 }
  0x57   :  { %354 = vsyncpa [#allocation4 + $0x1], 1 }

// kernel: head_layer_forward.2
= control target key start
LH: loop header
LB: loop body
LE: loop exit
PB: predicated region body
PF: predicated region fallthrough
CT: control target
= control target key end

     0   :  { %v519_v0 = vmov 0   ;;  %vm179_vm0 = vcmask 154624   ;;  %vm204_vm1 = vcmask 1040384   ;;  %vm205_vm2 = vcmask 1041408   ;;  %s772_s1 = inlined_call_operand.vmem [shape: bf16[147,64], index: 1, kind: input, shape index: {}]   ;;  %s773_s0 = inlined_call_operand.vmem [shape: bf16[128,147], index: 0, kind: input, shape index: {}]   ;;  %s774_s2 = inlined_call_operand.vmem [shape: f32[128,64], index: 2, kind: output, shape index: {0}]   ;;  %s775_s3 = inlined_call_operand.vmem [shape: f32[1,8,64], index: 3, kind: output, shape index: {1}]   ;;  %s776_s4 = inlined_call_operand.vmem [shape: f32[1,8,64], index: 4, kind: output, shape index: {2}]  }
   0x1   :  { %211 = vmatprep.subr.bf16.mxu0 %v519_v0  ;;  %v485_v1 = vld [vmem:[%s772_s1 + $0x38] sm:$0xff]   ;;  %463 = vmatprep.subr.bf16.mxu1 %v519_v0  ;;  %v486_v2 = vld [vmem:[%s772_s1 + $0x30] sm:$0xff]   ;;  %v487_v3 = vld [vmem:[%s772_s1 + $0x28] sm:$0xff]   ;;  %v520_v10 = vmov 65535   ;;  %vm308_vm3 = vcmask 523264  }
   0x2   :  { %212 = vmatpush1.bf16.msra.mxu0 %v485_v1  ;;  %473 = vmatpush1.bf16.msra.mxu1 %v485_v1  ;;  %v488_v4 = vld [vmem:[%s772_s1 + $0x20] sm:$0xff]   ;;  %v489_v7 = vld [vmem:[%s772_s1 + $0x18] sm:$0xff]   ;;  %v490_v8 = vld [vmem:[%s772_s1 + $0x10] sm:$0xff]   ;;  %v206_v11 = vsel %vm204_vm1, 4294967295, %v520_v10 }
   0x3   :  { %213 = vmatprep.subr.bf16.mxu0 %v519_v0  ;;  %464 = vmatprep.subr.bf16.mxu1 %v519_v0  ;;  %v497_v5 = vld [vmem:[%s773_s0 + $0x4] ss:$8 sps:$4 sm:$0xff]   ;;  %v493_v13 = vld [vmem:[%s772_s1 + $0x48] ss:$0 sps:$4 sm:$0x33]   ;;  %v207_v14 = vsel %vm205_vm2, %v206_v11, 0 }
   0x4   :  { %455 = vmatprep.mubr.msk.bf16.mxu0 %vm179_vm0, %v497_v5  ;;  %v503_v6 = vld [vmem:[%s773_s0 + $0x44] ss:$8 sps:$4 sm:$0xff]   ;;  %v209_v15 = vand.u32 %v493_v13, %v207_v14  ;;  %v495_v17 = vld [vmem:[%s773_s0] ss:$8 sps:$4 sm:$0xff]   ;;  %v498_v19 = vld [vmem:[%s773_s0 + $0x14] ss:$8 sps:$4 sm:$0xff]  }
   0x5   :  { %459 = vmatprep.mubr.msk.bf16.mxu1 %vm179_vm0, %v503_v6  ;;  %v491_v9 = vld [vmem:[%s772_s1 + $0x8] sm:$0xff]   ;;  %v492_v12 = vld [vmem:[%s772_s1] sm:$0xff]   ;;  %v507_v20 = vld [vmem:[%s773_s0 + $0x54] ss:$8 sps:$4 sm:$0xff]  }
   0x6   :  { %214 = vmatpush1.bf16.msra.mxu0 %v486_v2  ;;  %474 = vmatpush1.bf16.msra.mxu1 %v486_v2  ;;  %v494_v16 = vld [vmem:[%s772_s1 + $0x40] sm:$0xff]   ;;  %v500_v21 = vld [vmem:[%s773_s0 + $0x10] ss:$8 sps:$4 sm:$0xff]   ;;  %v510_v27 = vld [vmem:[%s773_s0 + $0x34] ss:$8 sps:$4 sm:$0xff]  }
   0x7   :  { %215 = vmatprep.subr.bf16.mxu0 %v519_v0  ;;  %465 = vmatprep.subr.bf16.mxu1 %v519_v0  ;;  %v501_v18 = vld [vmem:[%s773_s0 + $0x40] ss:$8 sps:$4 sm:$0xff]   ;;  %v509_v22 = vld [vmem:[%s773_s0 + $0x50] ss:$8 sps:$4 sm:$0xff]   ;;  %v504_v23 = vld [vmem:[%s773_s0 + $0x24] ss:$8 sps:$4 sm:$0xff]  }
   0x8   :  { %v513_v24 = vld [vmem:[%s773_s0 + $0x64] ss:$8 sps:$4 sm:$0xff]   ;;  %v506_v25 = vld [vmem:[%s773_s0 + $0x20] ss:$8 sps:$4 sm:$0xff]   ;;  %v516_v28 = vld [vmem:[%s773_s0 + $0x74] ss:$8 sps:$4 sm:$0xff]  }
   0x9   :  { %v515_v26 = vld [vmem:[%s773_s0 + $0x60] ss:$8 sps:$4 sm:$0xff]   ;;  %v512_v29 = vld [vmem:[%s773_s0 + $0x30] ss:$8 sps:$4 sm:$0xff]  }
   0xa   :  { %216 = vmatpush1.bf16.msra.mxu0 %v487_v3  ;;  %475 = vmatpush1.bf16.msra.mxu1 %v487_v3  ;;  %v518_v30 = vld [vmem:[%s773_s0 + $0x70] ss:$8 sps:$4 sm:$0xff]  }
   0xb   :  { %217 = vmatprep.subr.bf16.mxu0 %v519_v0  ;;  %466 = vmatprep.subr.bf16.mxu1 %v519_v0 }
   0xe   :  { %218 = vmatpush1.bf16.msra.mxu0 %v488_v4  ;;  %476 = vmatpush1.bf16.msra.mxu1 %v488_v4 }
   0xf   :  { %219 = vmatprep.subr.bf16.mxu0 %v519_v0  ;;  %467 = vmatprep.subr.bf16.mxu1 %v519_v0 }
  0x12   :  { %220 = vmatpush1.bf16.msra.mxu0 %v489_v7  ;;  %477 = vmatpush1.bf16.msra.mxu1 %v489_v7 }
  0x13   :  { %221 = vmatprep.subr.bf16.mxu0 %v519_v0  ;;  %468 = vmatprep.subr.bf16.mxu1 %v519_v0 }
  0x16   :  { %222 = vmatpush1.bf16.msra.mxu0 %v490_v8  ;;  %478 = vmatpush1.bf16.msra.mxu1 %v490_v8 }
  0x17   :  { %223 = vmatprep.subr.bf16.mxu0 %v519_v0  ;;  %469 = vmatprep.subr.bf16.mxu1 %v519_v0 }
  0x1a   :  { %224 = vmatpush1.bf16.msra.mxu0 %v491_v9  ;;  %479 = vmatpush1.bf16.msra.mxu1 %v491_v9 }
  0x1b   :  { %225 = vmatprep.subr.bf16.mxu0 %v519_v0  ;;  %470 = vmatprep.subr.bf16.mxu1 %v519_v0 }
  0x1e   :  { %226 = vmatpush1.bf16.msra.mxu0 %v492_v12  ;;  %480 = vmatpush1.bf16.msra.mxu1 %v492_v12 }
  0x1f   :  { %239 = vmatprep.subr.bf16.mxu0 %v519_v0  ;;  %471 = vmatprep.subr.bf16.mxu1 %v519_v0 }
  0x22   :  { %240 = vmatpush2.bf16.msra.mxu0 %v209_v15  ;;  %481 = vmatpush2.bf16.msra.mxu1 %v209_v15 }
  0x23   :  { %241 = vmatprep.subr.bf16.mxu0 %v519_v0  ;;  %472 = vmatprep.subr.bf16.mxu1 %v519_v0 }
  0x26   :  { %242 = vmatpush2.bf16.msra.mxu0 %v494_v16  ;;  %482 = vmatpush2.bf16.msra.mxu1 %v494_v16 }
  0x29   :  { %244 = vmatmul.mubr.bf16.vlgmr.msra.gmra.mxu0 %v495_v17  ;;  %276 = vmatmul.mubr.bf16.vlgmr.msra.gmra.mxu1 %v501_v18 }
  0x2a   :  { %456 = vmatprep.mubr.msk.bf16.mxu0 %vm179_vm0, %v498_v19  ;;  %460 = vmatprep.mubr.msk.bf16.mxu1 %vm179_vm0, %v507_v20 }
  0x31   :  { %252 = vmatmul.mubr.bf16.gmra.mxu0 %v500_v21  ;;  %284 = vmatmul.mubr.bf16.gmra.mxu1 %v509_v22 }
  0x32   :  { %457 = vmatprep.mubr.msk.bf16.mxu0 %vm179_vm0, %v504_v23  ;;  %461 = vmatprep.mubr.msk.bf16.mxu1 %vm179_vm0, %v513_v24 }
  0x39   :  { %260 = vmatmul.mubr.bf16.gmra.mxu0 %v506_v25  ;;  %292 = vmatmul.mubr.bf16.gmra.mxu1 %v515_v26 }
  0x3a   :  { %458 = vmatprep.mubr.msk.bf16.mxu0 %vm179_vm0, %v510_v27  ;;  %462 = vmatprep.mubr.msk.bf16.mxu1 %vm179_vm0, %v516_v28 }
  0x41   :  { %268 = vmatmul.mubr.bf16.gmra.mxu0 %v512_v29  ;;  %300 = vmatmul.mubr.bf16.gmra.mxu1 %v518_v30 }
  0xe9   :  { %v245_v31 = vpop.f32.mrf.mxu0  ;;  %v632_v32 = vpop.f32.mrf.mxu1 }
  0xea   :  { %309 = vst.msk [vmem:[%s774_s2] sm:$0xff] %vm308_vm3, %v245_v31  ;;  %317 = vst.msk [vmem:[%s774_s2 + $0x40] sm:$0xff] %vm308_vm3, %v632_v32  ;;  %v362_v48 = vmul.f32 %v245_v31, %v245_v31  ;;  %v325_v53 = vsel %vm308_vm3, %v245_v31, 0.0  ;;  %v370_v29 = vmul.f32 %v632_v32, %v632_v32 }
  0xeb   :  { %v247_v33 = vpop.f32.mrf.mxu0  ;;  %v279_v34 = vpop.f32.mrf.mxu1 }
  0xec   :  { %v378_v60 = vsel %vm308_vm3, %v362_v48, 0.0 }
  0xed   :  { %v248_v35 = vpop.f32.mrf.mxu0  ;;  %v643_v36 = vpop.f32.mrf.mxu1 }
  0xee   :  { %310 = vst.msk [vmem:[%s774_s2 + $0x8] sm:$0xff] %vm308_vm3, %v248_v35  ;;  %318 = vst.msk [vmem:[%s774_s2 + $0x48] sm:$0xff] %vm308_vm3, %v643_v36  ;;  %v363_v45 = vmul.f32 %v248_v35, %v248_v35  ;;  %v326_v49 = vsel %vm308_vm3, %v248_v35, 0.0 }
  0xef   :  { %v250_v37 = vpop.f32.mrf.mxu0  ;;  %v282_v38 = vpop.f32.mrf.mxu1  ;;  %v327_v57 = vadd.f32 %v326_v49, %v325_v53 }
  0xf0   :  { %v379_v54 = vsel %vm308_vm3, %v363_v45, 0.0  ;;  %v340_v38 = vsel %vm308_vm3, %v632_v32, 0.0  ;;  %v393_v45 = vsel %vm308_vm3, %v370_v29, 0.0 }
  0xf1   :  { %v253_v39 = vpop.f32.mrf.mxu0  ;;  %v654_v40 = vpop.f32.mrf.mxu1  ;;  %v380_v0 = vadd.f32 %v379_v54, %v378_v60 }
  0xf2   :  { %311 = vst.msk [vmem:[%s774_s2 + $0x10] sm:$0xff] %vm308_vm3, %v253_v39  ;;  %319 = vst.msk [vmem:[%s774_s2 + $0x50] sm:$0xff] %vm308_vm3, %v654_v40  ;;  %v364_v50 = vmul.f32 %v253_v39, %v253_v39  ;;  %v328_v55 = vsel %vm308_vm3, %v253_v39, 0.0  ;;  %v371_v39 = vmul.f32 %v643_v36, %v643_v36  ;;  %v344_v32 = vsel %vm308_vm3, %v654_v40, 0.0 }
  0xf3   :  { %v255_v41 = vpop.f32.mrf.mxu0  ;;  %v287_v42 = vpop.f32.mrf.mxu1  ;;  %v329_v1 = vadd.f32 %v328_v55, %v327_v57 }
  0xf4   :  { %v381_v61 = vsel %vm308_vm3, %v364_v50, 0.0  ;;  %v395_v50 = vsel %vm308_vm3, %v371_v39, 0.0 }
  0xf5   :  { %v256_v43 = vpop.f32.mrf.mxu0  ;;  %v665_v44 = vpop.f32.mrf.mxu1  ;;  %v382_v7 = vadd.f32 %v381_v61, %v380_v0 }
  0xf6   :  { %312 = vst.msk [vmem:[%s774_s2 + $0x18] sm:$0xff] %vm308_vm3, %v256_v43  ;;  %320 = vst.msk [vmem:[%s774_s2 + $0x58] sm:$0xff] %vm308_vm3, %v665_v44  ;;  %v365_v56 = vmul.f32 %v256_v43, %v256_v43  ;;  %v330_v62 = vsel %vm308_vm3, %v256_v43, 0.0 }
  0xf7   :  { %v258_v46 = vpop.f32.mrf.mxu0  ;;  %v290_v47 = vpop.f32.mrf.mxu1  ;;  %v331_v8 = vadd.f32 %v330_v62, %v329_v1 }
  0xf8   :  { %v383_v4 = vsel %vm308_vm3, %v365_v56, 0.0  ;;  %v342_v46 = vsel %vm308_vm3, %v643_v36, 0.0  ;;  %v372_v47 = vmul.f32 %v654_v40, %v654_v40  ;;  %v346_v36 = vsel %vm308_vm3, %v665_v44, 0.0 }
  0xf9   :  { %v261_v51 = vpop.f32.mrf.mxu0  ;;  %v677_v52 = vpop.f32.mrf.mxu1  ;;  %v384_v13 = vadd.f32 %v383_v4, %v382_v7 }
  0xfa   :  { %313 = vst.msk [vmem:[%s774_s2 + $0x20] sm:$0xff] %vm308_vm3, %v261_v51  ;;  %321 = vst.msk [vmem:[%s774_s2 + $0x60] sm:$0xff] %vm308_vm3, %v677_v52  ;;  %v366_v63 = vmul.f32 %v261_v51, %v261_v51  ;;  %v332_v5 = vsel %vm308_vm3, %v261_v51, 0.0  ;;  %v373_v51 = vmul.f32 %v665_v44, %v665_v44  ;;  %v397_v55 = vsel %vm308_vm3, %v372_v47, 0.0 }
  0xfb   :  { %v263_v58 = vpop.f32.mrf.mxu0  ;;  %v295_v59 = vpop.f32.mrf.mxu1  ;;  %v333_v14 = vadd.f32 %v332_v5, %v331_v8  ;;  %v374_v56 = vmul.f32 %v677_v52, %v677_v52  ;;  %v348_v40 = vsel %vm308_vm3, %v677_v52, 0.0 }
  0xfc   :  { %v385_v11 = vsel %vm308_vm3, %v366_v63, 0.0  ;;  %v399_v59 = vsel %vm308_vm3, %v373_v51, 0.0 }
  0xfd   :  { %v264_v2 = vpop.f32.mrf.mxu0  ;;  %v694_v3 = vpop.f32.mrf.mxu1  ;;  %v386_v20 = vadd.f32 %v385_v11, %v384_v13  ;;  %v401_v63 = vsel %vm308_vm3, %v374_v56, 0.0 }
  0xfe   :  { %314 = vst.msk [vmem:[%s774_s2 + $0x28] sm:$0xff] %vm308_vm3, %v264_v2  ;;  %v367_v6 = vmul.f32 %v264_v2, %v264_v2  ;;  %322 = vst.msk [vmem:[%s774_s2 + $0x68] sm:$0xff] %vm308_vm3, %v694_v3  ;;  %v334_v12 = vsel %vm308_vm3, %v264_v2, 0.0  ;;  %v375_v60 = vmul.f32 %v694_v3, %v694_v3  ;;  %v350_v44 = vsel %vm308_vm3, %v694_v3, 0.0 }
  0xff   :  { %v266_v9 = vpop.f32.mrf.mxu0  ;;  %v298_v10 = vpop.f32.mrf.mxu1  ;;  %v335_v21 = vadd.f32 %v334_v12, %v333_v14 }
 0x100   :  { %v387_v17 = vsel %vm308_vm3, %v367_v6, 0.0  ;;  %v403_v4 = vsel %vm308_vm3, %v375_v60, 0.0 }
 0x101   :  { %v269_v15 = vpop.f32.mrf.mxu0  ;;  %v301_v16 = vpop.f32.mrf.mxu1  ;;  %v388_v25 = vadd.f32 %v387_v17, %v386_v20 }
 0x102   :  { %315 = vst.msk [vmem:[%s774_s2 + $0x30] sm:$0xff] %vm308_vm3, %v269_v15  ;;  %v336_v18 = vsel %vm308_vm3, %v269_v15, 0.0  ;;  %v368_v19 = vmul.f32 %v269_v15, %v269_v15  ;;  %323 = vst.msk [vmem:[%s774_s2 + $0x70] sm:$0xff] %vm308_vm3, %v301_v16  ;;  %v376_v0 = vmul.f32 %v301_v16, %v301_v16  ;;  %v352_v5 = vsel %vm308_vm3, %v301_v16, 0.0 }
 0x103   :  { %v271_v22 = vpop.f32.mrf.mxu0  ;;  %v303_v23 = vpop.f32.mrf.mxu1  ;;  %v337_v26 = vadd.f32 %v336_v18, %v335_v21 }
 0x104   :  { %v389_v24 = vsel %vm308_vm3, %v368_v19, 0.0  ;;  %v405_v8 = vsel %vm308_vm3, %v376_v0, 0.0 }
 0x105   :  { %v272_v27 = vpop.f32.mrf.mxu0  ;;  %v304_v28 = vpop.f32.mrf.mxu1  ;;  %v390_v33 = vadd.f32 %v389_v24, %v388_v25 }
 0x106   :  { %316 = vst.msk [vmem:[%s774_s2 + $0x38] sm:$0xff] %vm308_vm3, %v272_v27  ;;  %v338_v30 = vsel %vm308_vm3, %v272_v27, 0.0  ;;  %v369_v31 = vmul.f32 %v272_v27, %v272_v27  ;;  %324 = vst.msk [vmem:[%s774_s2 + $0x78] sm:$0xff] %vm308_vm3, %v304_v28  ;;  %v377_v6 = vmul.f32 %v304_v28, %v304_v28  ;;  %v354_v9 = vsel %vm308_vm3, %v304_v28, 0.0 }
 0x107   :  { %v339_v34 = vadd.f32 %v338_v30, %v337_v26  ;;  %v274_v35 = vpop.f32.mrf.mxu0  ;;  %v306_v37 = vpop.f32.mrf.mxu1 }
 0x108   :  { %v391_v41 = vsel %vm308_vm3, %v369_v31, 0.0  ;;  %v407_v12 = vsel %vm308_vm3, %v377_v6, 0.0 }
 0x109   :  { %v341_v42 = vadd.f32 %v340_v38, %v339_v34  ;;  %v392_v43 = vadd.f32 %v391_v41, %v390_v33 }
 0x10b   :  { %v343_v48 = vadd.f32 %v342_v46, %v341_v42  ;;  %v394_v49 = vadd.f32 %v393_v45, %v392_v43 }
 0x10d   :  { %v396_v53 = vadd.f32 %v395_v50, %v394_v49  ;;  %v345_v54 = vadd.f32 %v344_v32, %v343_v48 }
 0x10f   :  { %v347_v57 = vadd.f32 %v346_v36, %v345_v54  ;;  %v398_v58 = vadd.f32 %v397_v55, %v396_v53 }
 0x111   :  { %v349_v61 = vadd.f32 %v348_v40, %v347_v57  ;;  %v400_v62 = vadd.f32 %v399_v59, %v398_v58 }
 0x113   :  { %v351_v1 = vadd.f32 %v350_v44, %v349_v61  ;;  %v402_v2 = vadd.f32 %v401_v63, %v400_v62 }
 0x115   :  { %v404_v7 = vadd.f32 %v403_v4, %v402_v2  ;;  %v353_v52 = vadd.f32 %v352_v5, %v351_v1 }
 0x117   :  { %v406_v10 = vadd.f32 %v405_v8, %v404_v7  ;;  %v355_v11 = vadd.f32 %v354_v9, %v353_v52 }
 0x119   :  { %v356_v13 = vrot.slane %v355_v11, 4  ;;  %v408_v3 = vadd.f32 %v407_v12, %v406_v10 }
 0x11b   :  { %v357_v14 = vadd.f32 %v356_v13, %v355_v11  ;;  %v409_v15 = vrot.slane %v408_v3, 4 }
 0x11d   :  { %v358_v17 = vrot.slane %v357_v14, 2  ;;  %v410_v18 = vadd.f32 %v409_v15, %v408_v3 }
 0x11f   :  { %v359_v19 = vadd.f32 %v358_v17, %v357_v14  ;;  %v411_v20 = vrot.slane %v410_v18, 2 }
 0x121   :  { %v360_v16 = vrot.slane %v359_v19, 1  ;;  %v412_v21 = vadd.f32 %v411_v20, %v410_v18 }
 0x123   :  { %v361_v22 = vadd.f32 %v360_v16, %v359_v19  ;;  %v413_v23 = vrot.slane %v412_v21, 1 }
 0x125   :  { %v414_v24 = vadd.f32 %v413_v23, %v412_v21  ;;  %415 = vst.msk [vmem:[%s775_s3] sm:$0xff] %vm308_vm3, %v361_v22 }
 0x127   :  { %416 = vst.msk [vmem:[%s776_s4] sm:$0xff] %vm308_vm3, %v414_v24 }

</bundles_post_ra>
